<compile_context>
chip_gen: v7x
topology: tpu7x:2x2x1
jax: 0.10.0
libtpu: 0.0.40
codegen_flags: <defaults>
</compile_context>

<pallas_src>
import functools

import jax
import jax.numpy as jnp
from jax.experimental import pallas as pl
from jax.experimental.pallas import tpu as pltpu


_OUT_SUB, _OUT_LANE = 8, 128   # one-vreg (sublane, lane)-aligned per-shard count tile


def _accuracy_kernel(scores_ref, target_ref, count_ref, *,
                     n_total, tile_m, tiles_per_shard):
    p = pl.program_id(0)   # shard (TensorCore) index   -- "parallel"
    j = pl.program_id(1)   # tile index within shard    -- "arbitrary" (reduction)

    # Per-shard accumulator lives in the resident output block: init once.
    @pl.when(j == 0)
    def _init():
        count_ref[...] = jnp.zeros_like(count_ref)

    scores = scores_ref[...]          # [TM, C] native dtype (no wrapper upcast)
    target = target_ref[...]          # [TM, 1] int32
    tm, c = scores.shape

    # argmax over the class axis with first-occurrence tie-breaking
    # (matches torch.argmax / jnp.argmax for ties).
    max_val = jnp.max(scores, axis=1, keepdims=True)                     # [TM, 1]
    col_ids = jax.lax.broadcasted_iota(jnp.int32, (tm, c), dimension=1)   # [TM, C]
    pred = jnp.min(jnp.where(scores == max_val, col_ids, jnp.int32(c)),
                   axis=1, keepdims=True)                                 # [TM, 1]
    # TODO(synk): chunk the class-axis max / tie-break over 128-lane slices if a
    # bundle dump shows the (TM, C) int32 intermediate or XLU reduces binding on
    # v7x for very large C (review rec applied conditionally, per its own note).

    # Mask rows beyond the real batch: partial last tile and any duplicated
    # (clamped) overflow tiles of the second shard contribute zero.
    t = p * tiles_per_shard + j       # global (unclamped) tile index
    row_ids = jax.lax.broadcasted_iota(jnp.int32, (tm, 1), dimension=0) + t * tile_m
    valid = row_ids < n_total

    correct = jnp.logical_and(pred == target, valid)                      # [TM, 1]
    # int32 count (exact for any realistic N); count_ref's (8,128) int32 block is
    # one vreg, so this is one vadd + one vst per step; HBM writeback once/shard.
    count_ref[...] += jnp.sum(correct.astype(jnp.int32))


def _vmem_capacity_bytes() -> int:
    """Per-core VMEM capacity; conservative (v7x-sized) fallback if unknown."""
    try:
        cap = getattr(pltpu.get_tpu_info(), "vmem_capacity_bytes", None)
        if cap:
            return int(cap)
    except Exception:
        pass
    return 64 * 1024 * 1024


def _pick_tile_m(n, c, itemsize, pair_budget_bytes):
    """Largest N-tile whose (scores + target) VMEM buffers fit `pair_budget_bytes`.

    Layout-aware: the scores row lane-pads to a multiple of 128 elements and the
    (tm, 1) int32 target column lane-pads to 128 lanes (512 B/row).
    """
    scores_row = pl.cdiv(c, 128) * 128 * itemsize      # lane-padded scores row
    target_row = 128 * 4                               # lane-padded int32 target row
    per_row = scores_row + target_row
    align = {4: 8, 2: 16, 1: 32}.get(itemsize, 8)      # sublane packing per dtype width
    tm = max(align, pair_budget_bytes // per_row)
    tm -= tm % align
    if tm >= n:
        return n                                       # single tile: full-dim block is legal
    return tm


def accuracy(scores: jax.Array, target: jax.Array):
    """Pallas equivalent of Accuracy.forward(scores, target) -> (N, acc).

    scores: [N, C] float (any TPU float dtype; kept native end-to-end)
    target: [N]    int   (class indices in [0, C))
    """
    n, c = scores.shape
    if n == 0:
        return 0, jnp.float32(jnp.nan)   # torch.mean of an empty tensor is NaN

    vmem_cap = _vmem_capacity_bytes()
    # 64 MiB scoped limit on 128-MiB chips (v5e/v6e), 32 MiB on 64-MiB chips (v7x).
    vmem_limit = int(min(vmem_cap // 2, 64 * 1024 * 1024))
    # One (scores + target) buffer pair; double-buffering brings it to ~3/4 of limit.
    pair_budget = (vmem_limit * 3) // 8

    tm = _pick_tile_m(n, c, jnp.dtype(scores.dtype).itemsize, pair_budget)
    total_tiles = pl.cdiv(n, tm)

    # Shard the batch across TensorCores only where there is more than one TC
    # (v7x: 64 MiB VMEM/TC, 2 TCs; v5e/v6e: 128 MiB, 1 TC).  On single-TC chips
    # the extra axis would only add an index-map clamp and duplicate-tile DMA.
    num_shards = 2 if (vmem_cap <= 64 * 1024 * 1024 and total_tiles >= 2) else 1
    tiles_per_shard = pl.cdiv(total_tiles, num_shards)
    grid = (num_shards, tiles_per_shard)

    if num_shards == 1:
        tile_map = lambda p, j: (j, 0)
    else:
        # Clamp so DMAs never start past the array; clamped (duplicate) tiles are
        # fully masked out inside the kernel via the global-row-id test.
        tile_map = lambda p, j: (jnp.minimum(p * tiles_per_shard + j, total_tiles - 1), 0)

    kernel = functools.partial(
        _accuracy_kernel, n_total=n, tile_m=tm, tiles_per_shard=tiles_per_shard)

    counts = pl.pallas_call(
        kernel,
        out_shape=jax.ShapeDtypeStruct((num_shards * _OUT_SUB, _OUT_LANE), jnp.int32),
        grid_spec=pltpu.PrefetchScalarGridSpec(
            num_scalar_prefetch=0,
            grid=grid,
            in_specs=[
                pl.BlockSpec((tm, c), tile_map),   # scores tiles, native dtype
                # TODO(synk): repack targets lane-dense ((num_tiles, 1, tm) blocks)
                # once the in-kernel (tm,1)<->(1,tm) relayout of `pred` is confirmed
                # to lower cleanly; that would halve VMEM/row for small C and turn
                # the target DMA into one contiguous copy.  Its padded cost is at
                # least accounted for in _pick_tile_m now.
                pl.BlockSpec((tm, 1), tile_map),   # target tiles, int32 column
            ],
            # Per-shard count block: resident across the reduction axis j,
            # disjoint across the parallel axis p -> written back once per shard.
            out_specs=pl.BlockSpec((_OUT_SUB, _OUT_LANE), lambda p, j: (p, 0)),
        ),
        compiler_params=pltpu.CompilerParams(
            dimension_semantics=("parallel", "arbitrary"),
            vmem_limit_bytes=vmem_limit,
        ),
    )(scores, target.astype(jnp.int32).reshape(n, 1))

    # Tiny finalize in the wrapper: sum the per-shard counts, divide by global N.
    total_correct = counts[::_OUT_SUB, 0].sum()
    acc = total_correct.astype(jnp.float32) / jnp.float32(n)
    return n, acc


if __name__ == "__main__":
    key = jax.random.PRNGKey(0)
    k_scores, k_target = jax.random.split(key)

    N, C = 8, 4  # small batch of 8 samples, 4 classes (iris-demo style)
    scores = jax.random.normal(k_scores, (N, C), dtype=jnp.float32)
    target = jax.random.randint(k_target, (N,), 0, C, dtype=jnp.int32)

    batch_size, acc = accuracy(scores, target)
    acc = jax.block_until_ready(acc)

    # reference check in plain JAX
    ref_acc = jnp.mean(
        (jnp.argmax(scores, axis=1).astype(jnp.int32) == target).astype(jnp.float32)
    )
    assert batch_size == N
    assert jnp.allclose(acc, ref_acc), (acc, ref_acc)

    print("KERNEL_OK")
</pallas_src>

<mosaic_0001>
module attributes {stable_mosaic.version = 11 : i64} {
  func.func @_accuracy_kernel(%arg0: i32, %arg1: i32, %arg2: memref<8x4xf32, #tpu.memory_space<vmem>>, %arg3: memref<8x1xi32, #tpu.memory_space<vmem>>, %arg4: memref<8x128xi32, #tpu.memory_space<vmem>>) attributes {dimension_semantics = [#tpu.dimension_semantics<parallel>, #tpu.dimension_semantics<arbitrary>], iteration_bounds = array<i64: 1, 1>, scalar_prefetch = 0 : i64, scratch_operands = 0 : i64, tpu.core_type = #tpu.core_type<tc>, window_params = [{transform_indices = @transform_0, window_bounds = array<i64: 8, 4>}, {transform_indices = @transform_1, window_bounds = array<i64: 8, 1>}, {transform_indices = @transform_2, window_bounds = array<i64: 8, 128>}]} {
    %c0_i32 = arith.constant 0 : i32
    %0 = arith.cmpi eq, %arg1, %c0_i32 : i32
    %1 = arith.extui %0 : i1 to i32
    %c0_i32_0 = arith.constant 0 : i32
    %2 = arith.cmpi ne, %1, %c0_i32_0 : i32
    scf.if %2 {
      %c0_i32_11 = arith.constant 0 : i32
      %33 = vector.broadcast %c0_i32_11 : i32 to vector<8x128xi32>
      %c0_12 = arith.constant 0 : index
      %c0_13 = arith.constant 0 : index
      %34 = vector.load %arg4[%c0_12, %c0_13] : memref<8x128xi32, #tpu.memory_space<vmem>>, vector<8x128xi32>
      tpu.vector_store %arg4[%c0_12, %c0_13], %33 {strides = array<i32>} : memref<8x128xi32, #tpu.memory_space<vmem>>, vector<8x128xi32>,
    } else {
    }
    %c0 = arith.constant 0 : index
    %c0_1 = arith.constant 0 : index
    %3 = vector.load %arg2[%c0, %c0_1] : memref<8x4xf32, #tpu.memory_space<vmem>>, vector<8x4xf32>
    %c0_2 = arith.constant 0 : index
    %c0_3 = arith.constant 0 : index
    %4 = vector.load %arg3[%c0_2, %c0_3] : memref<8x1xi32, #tpu.memory_space<vmem>>, vector<8x1xi32>
    %cst = arith.constant dense<0xFF800000> : vector<8xf32>
    %5 = vector.multi_reduction <maximumf>, %3, %cst [1] : vector<8x4xf32> to vector<8xf32>
    %6 = vector.shape_cast %5 : vector<8xf32> to vector<8x1xf32>
    %7 = tpu.iota {dimensions = array<i32: 1>} : vector<8x4xi32>
    %8 = vector.broadcast %6 : vector<8x1xf32> to vector<8x4xf32>
    %9 = arith.cmpf oeq, %3, %8 : vector<8x4xf32>
    %c4_i32 = arith.constant 4 : i32
    %10 = vector.broadcast %c4_i32 : i32 to vector<8x4xi32>
    %11 = arith.select %9, %7, %10 : vector<8x4xi1>, vector<8x4xi32>
    %cst_4 = arith.constant dense<2147483647> : vector<8xi32>
    %12 = vector.multi_reduction <minsi>, %11, %cst_4 [1] : vector<8x4xi32> to vector<8xi32>
    %13 = vector.shape_cast %12 : vector<8xi32> to vector<8x1xi32>
    %c1_i32 = arith.constant 1 : i32
    %14 = arith.muli %arg0, %c1_i32 : i32
    %15 = arith.addi %14, %arg1 : i32
    %16 = tpu.iota {dimensions = array<i32: 0>} : vector<8x1xi32>
    %c8_i32 = arith.constant 8 : i32
    %17 = arith.muli %15, %c8_i32 : i32
    %18 = vector.broadcast %17 : i32 to vector<8x1xi32>
    %19 = arith.addi %16, %18 : vector<8x1xi32>
    %c8_i32_5 = arith.constant 8 : i32
    %20 = vector.broadcast %c8_i32_5 : i32 to vector<8x1xi32>
    %21 = arith.cmpi slt, %19, %20 : vector<8x1xi32>
    %22 = arith.cmpi eq, %13, %4 : vector<8x1xi32>
    %23 = arith.andi %22, %21 : vector<8x1xi1>
    %c0_6 = arith.constant 0 : index
    %c0_7 = arith.constant 0 : index
    %24 = vector.load %arg4[%c0_6, %c0_7] : memref<8x128xi32, #tpu.memory_space<vmem>>, vector<8x128xi32>
    %25 = arith.extui %23 : vector<8x1xi1> to vector<8x1xi32>
    %26 = vector.shape_cast %25 : vector<8x1xi32> to vector<1x8x1xi32>
    %cst_8 = arith.constant dense<0> : vector<1xi32>
    %27 = vector.multi_reduction <add>, %26, %cst_8 [1, 2] : vector<1x8x1xi32> to vector<1xi32>
    %28 = vector.shape_cast %27 : vector<1xi32> to vector<1x1x1xi32>
    %29 = vector.extract %28[0, 0, 0] : i32 from vector<1x1x1xi32>
    %30 = vector.broadcast %29 : i32 to vector<8x128xi32>
    %31 = arith.addi %24, %30 : vector<8x128xi32>
    %c0_9 = arith.constant 0 : index
    %c0_10 = arith.constant 0 : index
    %32 = vector.load %arg4[%c0_9, %c0_10] : memref<8x128xi32, #tpu.memory_space<vmem>>, vector<8x128xi32>
    tpu.vector_store %arg4[%c0_9, %c0_10], %31 {strides = array<i32>} : memref<8x128xi32, #tpu.memory_space<vmem>>, vector<8x128xi32>,
    return
  }
  func.func @transform_0(%arg0: i32, %arg1: i32) -> (i32, i32) {
    %c0_i32 = arith.constant 0 : i32
    %c0_i32_0 = arith.constant 0 : i32
    return %arg1, %c0_i32 : i32, i32
  }
  func.func @transform_1(%arg0: i32, %arg1: i32) -> (i32, i32) {
    %c0_i32 = arith.constant 0 : i32
    %c0_i32_0 = arith.constant 0 : i32
    return %arg1, %c0_i32 : i32, i32
  }
  func.func @transform_2(%arg0: i32, %arg1: i32) -> (i32, i32) {
    %c0_i32 = arith.constant 0 : i32
    %c0_i32_0 = arith.constant 0 : i32
    return %arg0, %c0_i32 : i32, i32
  }
}

</mosaic_0001>

<bundles_post_ra>
// kernel: tpu_custom_call.1
= control target key start
LH: loop header
LB: loop body
LE: loop exit
PB: predicated region body
PF: predicated region fallthrough
CT: control target
= control target key end

     0   :  { %vm19_vm0 = vcmask 31744   ;;  %s154_s0 = inlined_call_operand.vmem [shape: f32[8,4], index: 0, kind: input, shape index: {}]   ;;  %s155_s1 = inlined_call_operand.vmem [shape: s32[8,1], index: 1, kind: input, shape index: {}]   ;;  %s156_s2 = inlined_call_operand.hbm [shape: s32[8,128], index: 2, kind: output, shape index: {}]  }
   0x1   :  { %v17_v0 = vld [vmem:[%s154_s0] sm:$0xff] }
   0x2   :  { %7 = vsyncpa [#allocation3], 0  ;;  %v20_v1 = vsel %vm19_vm0, %v17_v0, -inf  ;;  %v23_v2 = vlaneseq  ;;  %v18_v17 = vld [vmem:[%s155_s1] sm:$0xff]  ;;  %vm53_vm3 = vcmask 7168   ;;  %v119_v19 = vmov 0  }
   0x3   :  { %21 = vmax.xlane.f32.xlu0 %v20_v1  ;;  %s120_s1 = smov [#allocation2]  }
   0x4   :  { %v24_v3 = vand.u32 127, %v23_v2  ;;  %s83_s12 = sshll.u32 %s120_s1, 4  ;;  %s84_s12 = int_to_ptr.vmem [resolvable:$true] %s83_s12 }
   0x5   :  { %s95_s14 = scalar_lea.vmem %s84_s12, 128  ;;  %p100_p1 = scmp.lt.s32.totalorder %s84_s12, %s84_s12 }
   0x6   :  { %p96_p0 = scmp.ne.s32.totalorder %s84_s12, %s95_s14  ;;  %p101_p2 = scmp.lt.s32.totalorder %s95_s14, %s95_s14 }
   0x8   :  { %p102_p3 = por %p101_p2, %p100_p1 }
   0xa   :  { %p103_p4 = pnand %p102_p3, %p96_p0 }
  0x90   :  { %v22_v4 = vpop.xlane.xlu0 %21 }
  0x91   :  { %vm25_vm1 = vcmp.eq.f32.partialorder %v17_v0, %v22_v4 }
  0x92   :  { %v26_v5 = vsel %vm25_vm1, %v24_v3, 4 }
  0x93   :  { %v27_v6 = vsel %vm19_vm0, %v26_v5, 2147483647 }
  0x94   :  { %v29_v7 = vshra.s32 %v27_v6, 16  ;;  %v28_v9 = vand.u32 65535, %v27_v6 }
  0x96   :  { %v31_v8 = vcvt.s32.f32 %v29_v7  ;;  %v30_v11 = vcvt.s32.f32 %v28_v9 }
  0x98   :  { %32 = vmin.xlane.f32.xlu0 %v31_v8 }
 0x125   :  { %v33_v10 = vpop.xlane.xlu0 %32 }
 0x126   :  { %vm34_vm2 = vcmp.eq.f32.partialorder %v31_v8, %v33_v10  ;;  %v39_v13 = vcvt.f32.s32 %v33_v10 }
 0x127   :  { %v35_v12 = vsel %vm34_vm2, %v30_v11, inf }
 0x128   :  { %36 = vmin.xlane.f32.xlu1 %v35_v12  ;;  %v40_v15 = vshll.u32 %v39_v13, 16 }
 0x1b5   :  { %v37_v14 = vpop.xlane.xlu1 %36 }
 0x1b6   :  { %v38_v16 = vcvt.f32.s32 %v37_v14 }
 0x1b8   :  { %v41_v18 = vadd.s32 %v40_v15, %v38_v16 }
 0x1ba   :  { %vm49_vm4 = vcmp.eq.s32.totalorder %v41_v18, %v18_v17 }
 0x1bb   :  { %v52_v20 = vsel %vm49_vm4, 1, %v119_v19 }
 0x1bc   :  { %v54_v21 = vsel %vm53_vm3, %v52_v20, 0 }
 0x1bd   :  { %v56_v22 = vshrl.u32 %v54_v21, 16  ;;  %v55_v23 = vand.u32 65535, %v54_v21 }
 0x1bf   :  { %v58_v24 = vcvt.s32.f32 %v56_v22  ;;  %v57_v25 = vcvt.s32.f32 %v55_v23 }
 0x1c1   :  { %61 = vadd.xlane.f32.xlu1 %v58_v24  ;;  %59 = vadd.xlane.f32.xlu0 %v57_v25 }
 0x24e   :  { %v62_v26 = vpop.xlane.xlu1 %61  ;;  %v60_v27 = vpop.xlane.xlu0 %59 }
 0x24f   :  { %v64_v28 = vcvt.f32.s32 %v62_v26  ;;  %v63_v30 = vcvt.f32.s32 %v60_v27 }
 0x251   :  { %v65_v29 = vshll.u32 %v64_v28, 16 }
 0x253   :  { %v66_v31 = vadd.s32 %v65_v29, %v63_v30 }
 0x255   :  { %v67_v32 = vrot.slane %v66_v31, 4 }
 0x257   :  { %v68_v33 = vadd.s32 %v67_v32, %v66_v31 }
 0x259   :  { %v69_v34 = vrot.slane %v68_v33, 2 }
 0x25b   :  { %v70_v35 = vadd.s32 %v69_v34, %v68_v33 }
 0x25d   :  { %v71_v36 = vrot.slane %v70_v35, 1 }
 0x25f   :  { %v72_v37 = vadd.s32 %v71_v36, %v70_v35 }
 0x261   :  { %91 = vpush %v72_v37 }
 0x292   :  { %s92_s13 = spop %91 }
 0x293   :  { %v74_v38 = vstv %s92_s13 }
 0x294   :  { %76 = vst [vmem:[#allocation2] sm:$0xff] %v74_v38 }
 0x295   :  { %106 = shalt.err (!%p103_p4)
}
 0x296   :  { %s107_s17 = scalar_lea.hbm %s156_s2, 128 }
 0x297   :  { %p108_p5 = scmp.ne.s32.totalorder %s156_s2, %s107_s17  ;;  %p111_p6 = scmp.lt.u32.totalorder %s107_s17, %s156_s2 }
 0x299   :  { %p113_p7 = pnand %p111_p6, %p108_p5 }
 0x29b   :  { %116 = shalt.err (!%p113_p7)
}
 0x29c   :  { %86 = dma.vmem_to_hbm [thread:$0]  %s84_s12, 128, %s156_s2, [#allocation3]  }
 0x29d   :  { %117 = dma.done.wait [#allocation3], 128  }
 0x29e   :  { %118 = vsyncadd [#allocation3], 4294967168 }
 0x29f   :  { %90 = vsyncpa [#allocation3], 1 }

</bundles_post_ra>
